<compile_context>
chip_gen: v7x
topology: tpu7x:2x2x1
jax: 0.10.0
libtpu: 0.0.40
codegen_flags: <defaults>
</compile_context>

<pallas_src>
import functools

import jax
import jax.numpy as jnp
from jax.experimental import pallas as pl
from jax.experimental.pallas import tpu as pltpu

HEAD_PAD = 128  # lane-dense padded width for the fused mean/log_std head
H3_PAD = 128    # fc3 output padded from 64 -> 128 columns (lane-dense)


def _round_up(x, m):
    return (x + m - 1) // m * m


def actor_kernel(x_ref,
                 w1_ref, b1_ref,
                 w2_ref, b2_ref,
                 w3_ref, b3_ref,
                 wh_ref, bh_ref,
                 out_ref):
    # fc1 + ReLU  (dropout1 == identity in eval mode)
    x = x_ref[...]  # already bf16 (cast in wrapper)
    h1 = jnp.dot(x, w1_ref[...], preferred_element_type=jnp.float32) + b1_ref[...]
    h1 = jnp.maximum(h1, 0.0)

    # fc2 + ReLU  (dropout2 == identity in eval mode)
    h2 = jnp.dot(h1.astype(jnp.bfloat16), w2_ref[...],
                 preferred_element_type=jnp.float32) + b2_ref[...]
    h2 = jnp.maximum(h2, 0.0)

    # fc3 + ReLU (padded to 128 lane-dense columns; extra cols are exact zeros)
    h3 = jnp.dot(h2.astype(jnp.bfloat16), w3_ref[...],
                 preferred_element_type=jnp.float32) + b3_ref[...]
    h3 = jnp.maximum(h3, 0.0)

    # fused heads: columns [0, A) = mean, [A, 2A) = log_std, rest = zero pad
    out_ref[...] = (jnp.dot(h3.astype(jnp.bfloat16), wh_ref[...],
                            preferred_element_type=jnp.float32)
                    + bh_ref[...]).astype(out_ref.dtype)


@functools.partial(jax.jit, static_argnames=("action_dim", "tb"))
def actor_forward(state, params, *, action_dim, tb=1024):
    """state: (B, state_dim) float32. Returns (mean, log_std), each (B, action_dim) f32."""
    B, state_dim = state.shape
    assert 2 * action_dim <= HEAD_PAD, "fused head pad too small for action_dim"

    # Batch tile: multiple of 8 sublanes. Prefer >= 2 grid steps (v7x megacore,
    # DMA/compute overlap) while amortizing the ~0.35us/step overhead.
    B8 = _round_up(B, 8)
    TB = min(tb, B8)
    if B8 >= 16:
        TB = min(TB, _round_up(-(-B8 // 2), 8))  # guarantee >= 2 steps
    TB = max(TB, 8)
    B_pad = _round_up(B, TB)

    x = state.astype(jnp.bfloat16)
    if B_pad != B:
        x = jnp.pad(x, ((0, B_pad - B), (0, 0)))

    x_spec = pl.BlockSpec((TB, state_dim), lambda i: (i, 0))
    out_spec = pl.BlockSpec((TB, HEAD_PAD), lambda i: (i, 0))

    def resident(arr):
        # Full-array block, constant index -> DMA'd once, stays resident in VMEM.
        return pl.BlockSpec(arr.shape, lambda i: (0,) * arr.ndim)

    args = (x,
            params["w1"], params["b1"],
            params["w2"], params["b2"],
            params["w3"], params["b3"],
            params["wh"], params["bh"])
    in_specs = [x_spec] + [resident(a) for a in args[1:]]

    out = pl.pallas_call(
        actor_kernel,
        out_shape=jax.ShapeDtypeStruct((B_pad, HEAD_PAD), jnp.bfloat16),
        grid=(B_pad // TB,),
        in_specs=in_specs,
        out_specs=out_spec,
        compiler_params=pltpu.CompilerParams(
            dimension_semantics=("parallel",)),
    )(*args)

    mean = out[:B, :action_dim].astype(jnp.float32)
    log_std = out[:B, action_dim:2 * action_dim].astype(jnp.float32)
    return mean, log_std


def init_actor_params(key, state_dim, action_dim):
    """Deterministic init mirroring the PyTorch module's __init__.

    Weights stored pre-transposed as (in, out) and in bf16 (MXU operand dtype);
    biases kept in f32 (VPU-side adds stay f32).  fc3 / heads are zero-padded
    to lane-dense 128-wide blocks (padding contributes exact zeros).
    """
    assert 2 * action_dim <= HEAD_PAD
    k1, k2, k3, k4, k5 = jax.random.split(key, 5)
    ortho = jax.nn.initializers.orthogonal()

    # PyTorch Linear weight is (out, in); orthogonal_ is applied to that shape.
    w1 = ortho(k1, (128, state_dim), jnp.float32).T
    w2 = ortho(k2, (256, 128), jnp.float32).T
    w3_real = ortho(k3, (64, 256), jnp.float32).T          # (256, 64)
    wm = jax.random.uniform(k4, (64, action_dim), jnp.float32, -0.003, 0.003)
    ws = jax.random.uniform(k5, (64, action_dim), jnp.float32, -0.003, 0.003)

    # Pad fc3 to 128 output columns (lane-dense activation chain).
    w3 = jnp.zeros((256, H3_PAD), jnp.float32).at[:, :64].set(w3_real)

    # Fuse + lane-pad the two heads into one (H3_PAD, HEAD_PAD) weight; only
    # the top 64 rows (real fc3 features) are non-zero.
    wh = jnp.zeros((H3_PAD, HEAD_PAD), jnp.float32)
    wh = wh.at[:64, :action_dim].set(wm)
    wh = wh.at[:64, action_dim:2 * action_dim].set(ws)

    # fc biases are constant-0 per the PyTorch init; head biases zeroed too.
    # TODO(synk): PyTorch's default uniform bias init for mean/log_std layers
    # is replaced with zeros (intentional numerics simplification).
    return {
        "w1": w1.astype(jnp.bfloat16), "b1": jnp.zeros((1, 128), jnp.float32),
        "w2": w2.astype(jnp.bfloat16), "b2": jnp.zeros((1, 256), jnp.float32),
        "w3": w3.astype(jnp.bfloat16), "b3": jnp.zeros((1, H3_PAD), jnp.float32),
        "wh": wh.astype(jnp.bfloat16), "bh": jnp.zeros((1, HEAD_PAD), jnp.float32),
    }


if __name__ == "__main__":
    key = jax.random.PRNGKey(0)
    k_params, k_state = jax.random.split(key)

    batch = 2
    state_dim = 8
    action_dim = 4

    params = init_actor_params(k_params, state_dim, action_dim)
    state = jax.random.normal(k_state, (batch, state_dim), jnp.float32)

    mean, log_std = actor_forward(state, params, action_dim=action_dim)
    jax.block_until_ready((mean, log_std))

    assert mean.shape == (batch, action_dim)
    assert log_std.shape == (batch, action_dim)
    assert bool(jnp.all(jnp.isfinite(mean))) and bool(jnp.all(jnp.isfinite(log_std)))

    # Cross-check against a pure-JAX reference (same bf16 weights, f32 accum).
    def ref_forward(s, p):
        sb = s.astype(jnp.bfloat16).astype(jnp.float32)
        h = jnp.maximum(sb @ p["w1"].astype(jnp.float32) + p["b1"], 0.0)
        h = jnp.maximum(h @ p["w2"].astype(jnp.float32) + p["b2"], 0.0)
        h = jnp.maximum(h @ p["w3"].astype(jnp.float32) + p["b3"], 0.0)
        o = h @ p["wh"].astype(jnp.float32) + p["bh"]
        return o[:, :action_dim], o[:, action_dim:2 * action_dim]

    rm, rs = ref_forward(state, params)
    assert jnp.allclose(mean, rm, atol=1e-2, rtol=1e-2)
    assert jnp.allclose(log_std, rs, atol=1e-2, rtol=1e-2)

    print("KERNEL_OK")
</pallas_src>

<mosaic_0001>
module attributes {stable_mosaic.version = 11 : i64} {
  func.func @actor_kernel(%arg0: i32, %arg1: memref<8x8xbf16, #tpu.memory_space<vmem>>, %arg2: memref<8x128xbf16, #tpu.memory_space<vmem>>, %arg3: memref<1x128xf32, #tpu.memory_space<vmem>>, %arg4: memref<128x256xbf16, #tpu.memory_space<vmem>>, %arg5: memref<1x256xf32, #tpu.memory_space<vmem>>, %arg6: memref<256x128xbf16, #tpu.memory_space<vmem>>, %arg7: memref<1x128xf32, #tpu.memory_space<vmem>>, %arg8: memref<128x128xbf16, #tpu.memory_space<vmem>>, %arg9: memref<1x128xf32, #tpu.memory_space<vmem>>, %arg10: memref<8x128xbf16, #tpu.memory_space<vmem>>) attributes {dimension_semantics = [#tpu.dimension_semantics<parallel>], iteration_bounds = array<i64: 1>, scalar_prefetch = 0 : i64, scratch_operands = 0 : i64, tpu.core_type = #tpu.core_type<tc>, window_params = [{transform_indices = @transform_0, window_bounds = array<i64: 8, 8>}, {pipeline_mode = #tpu.pipeline_mode<synchronous>, transform_indices = @transform_1, window_bounds = array<i64: 8, 128>}, {pipeline_mode = #tpu.pipeline_mode<synchronous>, transform_indices = @transform_2, window_bounds = array<i64: 1, 128>}, {pipeline_mode = #tpu.pipeline_mode<synchronous>, transform_indices = @transform_3, window_bounds = array<i64: 128, 256>}, {pipeline_mode = #tpu.pipeline_mode<synchronous>, transform_indices = @transform_4, window_bounds = array<i64: 1, 256>}, {pipeline_mode = #tpu.pipeline_mode<synchronous>, transform_indices = @transform_5, window_bounds = array<i64: 256, 128>}, {pipeline_mode = #tpu.pipeline_mode<synchronous>, transform_indices = @transform_6, window_bounds = array<i64: 1, 128>}, {pipeline_mode = #tpu.pipeline_mode<synchronous>, transform_indices = @transform_7, window_bounds = array<i64: 128, 128>}, {pipeline_mode = #tpu.pipeline_mode<synchronous>, transform_indices = @transform_8, window_bounds = array<i64: 1, 128>}, {transform_indices = @transform_9, window_bounds = array<i64: 8, 128>}]} {
    %c0 = arith.constant 0 : index
    %c0_0 = arith.constant 0 : index
    %0 = vector.load %arg1[%c0, %c0_0] : memref<8x8xbf16, #tpu.memory_space<vmem>>, vector<8x8xbf16>
    %c0_1 = arith.constant 0 : index
    %c0_2 = arith.constant 0 : index
    %1 = vector.load %arg2[%c0_1, %c0_2] : memref<8x128xbf16, #tpu.memory_space<vmem>>, vector<8x128xbf16>
    %cst = arith.constant dense<0.000000e+00> : vector<8x128xf32>
    %2 = tpu.matmul %0, %1, %cst {dimension_numbers = #tpu.dot_dimension_numbers<[1], [0], [0], [1], [0, 0, 1, 1], [], []>} : vector<8x8xbf16>, vector<8x128xbf16>, vector<8x128xf32> -> vector<8x128xf32>
    %c0_3 = arith.constant 0 : index
    %c0_4 = arith.constant 0 : index
    %3 = vector.load %arg3[%c0_3, %c0_4] : memref<1x128xf32, #tpu.memory_space<vmem>>, vector<1x128xf32>
    %4 = vector.broadcast %3 : vector<1x128xf32> to vector<8x128xf32>
    %5 = arith.addf %2, %4 : vector<8x128xf32>
    %cst_5 = arith.constant 0.000000e+00 : f32
    %6 = vector.broadcast %cst_5 : f32 to vector<8x128xf32>
    %7 = arith.maximumf %5, %6 : vector<8x128xf32>
    %8 = arith.truncf %7 : vector<8x128xf32> to vector<8x128xbf16>
    %c0_6 = arith.constant 0 : index
    %c0_7 = arith.constant 0 : index
    %9 = vector.load %arg4[%c0_6, %c0_7] : memref<128x256xbf16, #tpu.memory_space<vmem>>, vector<128x256xbf16>
    %cst_8 = arith.constant dense<0.000000e+00> : vector<8x256xf32>
    %10 = tpu.matmul %8, %9, %cst_8 {dimension_numbers = #tpu.dot_dimension_numbers<[1], [0], [0], [1], [0, 0, 1, 1], [], []>} : vector<8x128xbf16>, vector<128x256xbf16>, vector<8x256xf32> -> vector<8x256xf32>
    %c0_9 = arith.constant 0 : index
    %c0_10 = arith.constant 0 : index
    %11 = vector.load %arg5[%c0_9, %c0_10] : memref<1x256xf32, #tpu.memory_space<vmem>>, vector<1x256xf32>
    %12 = vector.broadcast %11 : vector<1x256xf32> to vector<8x256xf32>
    %13 = arith.addf %10, %12 : vector<8x256xf32>
    %cst_11 = arith.constant 0.000000e+00 : f32
    %14 = vector.broadcast %cst_11 : f32 to vector<8x256xf32>
    %15 = arith.maximumf %13, %14 : vector<8x256xf32>
    %16 = arith.truncf %15 : vector<8x256xf32> to vector<8x256xbf16>
    %c0_12 = arith.constant 0 : index
    %c0_13 = arith.constant 0 : index
    %17 = vector.load %arg6[%c0_12, %c0_13] : memref<256x128xbf16, #tpu.memory_space<vmem>>, vector<256x128xbf16>
    %cst_14 = arith.constant dense<0.000000e+00> : vector<8x128xf32>
    %18 = tpu.matmul %16, %17, %cst_14 {dimension_numbers = #tpu.dot_dimension_numbers<[1], [0], [0], [1], [0, 0, 1, 1], [], []>} : vector<8x256xbf16>, vector<256x128xbf16>, vector<8x128xf32> -> vector<8x128xf32>
    %c0_15 = arith.constant 0 : index
    %c0_16 = arith.constant 0 : index
    %19 = vector.load %arg7[%c0_15, %c0_16] : memref<1x128xf32, #tpu.memory_space<vmem>>, vector<1x128xf32>
    %20 = vector.broadcast %19 : vector<1x128xf32> to vector<8x128xf32>
    %21 = arith.addf %18, %20 : vector<8x128xf32>
    %cst_17 = arith.constant 0.000000e+00 : f32
    %22 = vector.broadcast %cst_17 : f32 to vector<8x128xf32>
    %23 = arith.maximumf %21, %22 : vector<8x128xf32>
    %24 = arith.truncf %23 : vector<8x128xf32> to vector<8x128xbf16>
    %c0_18 = arith.constant 0 : index
    %c0_19 = arith.constant 0 : index
    %25 = vector.load %arg8[%c0_18, %c0_19] : memref<128x128xbf16, #tpu.memory_space<vmem>>, vector<128x128xbf16>
    %cst_20 = arith.constant dense<0.000000e+00> : vector<8x128xf32>
    %26 = tpu.matmul %24, %25, %cst_20 {dimension_numbers = #tpu.dot_dimension_numbers<[1], [0], [0], [1], [0, 0, 1, 1], [], []>} : vector<8x128xbf16>, vector<128x128xbf16>, vector<8x128xf32> -> vector<8x128xf32>
    %c0_21 = arith.constant 0 : index
    %c0_22 = arith.constant 0 : index
    %27 = vector.load %arg9[%c0_21, %c0_22] : memref<1x128xf32, #tpu.memory_space<vmem>>, vector<1x128xf32>
    %28 = vector.broadcast %27 : vector<1x128xf32> to vector<8x128xf32>
    %29 = arith.addf %26, %28 : vector<8x128xf32>
    %30 = arith.truncf %29 : vector<8x128xf32> to vector<8x128xbf16>
    %c0_23 = arith.constant 0 : index
    %c0_24 = arith.constant 0 : index
    %31 = vector.load %arg10[%c0_23, %c0_24] : memref<8x128xbf16, #tpu.memory_space<vmem>>, vector<8x128xbf16>
    tpu.vector_store %arg10[%c0_23, %c0_24], %30 {strides = array<i32>} : memref<8x128xbf16, #tpu.memory_space<vmem>>, vector<8x128xbf16>,
    return
  }
  func.func @transform_0(%arg0: i32) -> (i32, i32) {
    %c0_i32 = arith.constant 0 : i32
    %c0_i32_0 = arith.constant 0 : i32
    return %arg0, %c0_i32 : i32, i32
  }
  func.func @transform_1(%arg0: i32) -> (i32, i32) {
    %c0_i32 = arith.constant 0 : i32
    %c0_i32_0 = arith.constant 0 : i32
    %c0_i32_1 = arith.constant 0 : i32
    return %c0_i32, %c0_i32_0 : i32, i32
  }
  func.func @transform_2(%arg0: i32) -> (i32, i32) {
    %c0_i32 = arith.constant 0 : i32
    %c0_i32_0 = arith.constant 0 : i32
    %c0_i32_1 = arith.constant 0 : i32
    return %c0_i32, %c0_i32_0 : i32, i32
  }
  func.func @transform_3(%arg0: i32) -> (i32, i32) {
    %c0_i32 = arith.constant 0 : i32
    %c0_i32_0 = arith.constant 0 : i32
    %c0_i32_1 = arith.constant 0 : i32
    return %c0_i32, %c0_i32_0 : i32, i32
  }
  func.func @transform_4(%arg0: i32) -> (i32, i32) {
    %c0_i32 = arith.constant 0 : i32
    %c0_i32_0 = arith.constant 0 : i32
    %c0_i32_1 = arith.constant 0 : i32
    return %c0_i32, %c0_i32_0 : i32, i32
  }
  func.func @transform_5(%arg0: i32) -> (i32, i32) {
    %c0_i32 = arith.constant 0 : i32
    %c0_i32_0 = arith.constant 0 : i32
    %c0_i32_1 = arith.constant 0 : i32
    return %c0_i32, %c0_i32_0 : i32, i32
  }
  func.func @transform_6(%arg0: i32) -> (i32, i32) {
    %c0_i32 = arith.constant 0 : i32
    %c0_i32_0 = arith.constant 0 : i32
    %c0_i32_1 = arith.constant 0 : i32
    return %c0_i32, %c0_i32_0 : i32, i32
  }
  func.func @transform_7(%arg0: i32) -> (i32, i32) {
    %c0_i32 = arith.constant 0 : i32
    %c0_i32_0 = arith.constant 0 : i32
    %c0_i32_1 = arith.constant 0 : i32
    return %c0_i32, %c0_i32_0 : i32, i32
  }
  func.func @transform_8(%arg0: i32) -> (i32, i32) {
    %c0_i32 = arith.constant 0 : i32
    %c0_i32_0 = arith.constant 0 : i32
    %c0_i32_1 = arith.constant 0 : i32
    return %c0_i32, %c0_i32_0 : i32, i32
  }
  func.func @transform_9(%arg0: i32) -> (i32, i32) {
    %c0_i32 = arith.constant 0 : i32
    %c0_i32_0 = arith.constant 0 : i32
    return %arg0, %c0_i32 : i32, i32
  }
}

</mosaic_0001>

<bundles_post_ra>
// kernel: actor_forward.1
= control target key start
LH: loop header
LB: loop body
LE: loop exit
PB: predicated region body
PF: predicated region fallthrough
CT: control target
= control target key end

     0   :  { %14 = vsyncpa [#allocation3], 0  ;;  %s949_s0 = inlined_call_operand.vmem [shape: bf16[8,8], index: 0, kind: input, shape index: {}]   ;;  %s950_s1 = inlined_call_operand.vmem [shape: bf16[8,128], index: 1, kind: input, shape index: {}]   ;;  %s951_s2 = inlined_call_operand.vmem [shape: f32[1,128], index: 2, kind: input, shape index: {}]   ;;  %s952_s3 = inlined_call_operand.hbm [shape: bf16[128,256], index: 3, kind: input, shape index: {}]   ;;  %s953_s4 = inlined_call_operand.vmem [shape: f32[1,256], index: 4, kind: input, shape index: {}]   ;;  %s954_s5 = inlined_call_operand.hbm [shape: bf16[256,128], index: 5, kind: input, shape index: {}]   ;;  %s955_s6 = inlined_call_operand.vmem [shape: f32[1,128], index: 6, kind: input, shape index: {}]   ;;  %s956_s7 = inlined_call_operand.hbm [shape: bf16[128,128], index: 7, kind: input, shape index: {}]   ;;  %s957_s8 = inlined_call_operand.vmem [shape: f32[1,128], index: 8, kind: input, shape index: {}]   ;;  %s958_s9 = inlined_call_operand.vmem [shape: bf16[8,128], index: 9, kind: output, shape index: {}]  }
   0x1   :  { %15 = vsyncpa [#allocation5], 0  ;;  %s813_s30 = smov [#allocation4]   ;;  %s743_s13 = scalar_lea.hbm %s954_s5, 2048 }
   0x2   :  { %s41_s10 = sshll.u32 %s813_s30, 4  ;;  %p744_p0 = scmp.ne.s32.totalorder %s954_s5, %s743_s13  ;;  %s42_s10 = int_to_ptr.vmem [resolvable:$true] %s41_s10 }
   0x3   :  { %p747_p1 = scmp.lt.u32.totalorder %s743_s13, %s954_s5 }
   0x5   :  { %p749_p2 = pnand %p747_p1, %p744_p0 }
   0x7   :  { %752 = shalt.err (!%p749_p2)
}
   0x8   :  { %s753_s18 = scalar_lea.vmem %s42_s10, 2048  ;;  %p758_p4 = scmp.lt.s32.totalorder %s42_s10, %s42_s10 }
   0x9   :  { %p754_p3 = scmp.ne.s32.totalorder %s42_s10, %s753_s18  ;;  %p759_p5 = scmp.lt.s32.totalorder %s753_s18, %s753_s18 }
   0xb   :  { %p760_p6 = por %p759_p5, %p758_p4 }
   0xd   :  { %p761_p7 = pnand %p760_p6, %p754_p3 }
   0xf   :  { %764 = shalt.err (!%p761_p7)
}
  0x10   :  { %s814_s19 = smov 64   ;;  %s815_s20 = smov 4  }
  0x11   :  { %47 = dma.hbm_to_vmem [thread:$0]  %s954_s5, 2048, %s42_s10, [#allocation5], %s814_s19, %s814_s19, %s815_s20  }
  0x12   :  { %s816_s23 = smov [#allocation2]   ;;  %s765_s27 = scalar_lea.hbm %s952_s3, 2048 }
  0x13   :  { %s27_s24 = sshll.u32 %s816_s23, 4  ;;  %p766_p8 = scmp.ne.s32.totalorder %s952_s3, %s765_s27  ;;  %s28_s24 = int_to_ptr.vmem [resolvable:$true] %s27_s24 }
  0x14   :  { %p769_p9 = scmp.lt.u32.totalorder %s765_s27, %s952_s3 }
  0x16   :  { %p771_p10 = pnand %p769_p9, %p766_p8 }
  0x18   :  { %774 = shalt.err (!%p771_p10)
}
  0x19   :  { %s775_s12 = scalar_lea.vmem %s28_s24, 2048  ;;  %p780_p12 = scmp.lt.s32.totalorder %s28_s24, %s28_s24 }
  0x1a   :  { %p776_p11 = scmp.ne.s32.totalorder %s28_s24, %s775_s12  ;;  %p781_p13 = scmp.lt.s32.totalorder %s775_s12, %s775_s12 }
  0x1c   :  { %p782_p0 = por %p781_p13, %p780_p12 }
  0x1e   :  { %p783_p1 = pnand %p782_p0, %p776_p11 }
  0x20   :  { %786 = shalt.err (!%p783_p1)
}
  0x21   :  { %s817_s5 = smov 128   ;;  %s818_s10 = smov 8  }
  0x22   :  { %33 = dma.hbm_to_vmem [thread:$0]  %s952_s3, 2048, %s28_s24, [#allocation3], %s817_s5, %s817_s5, %s818_s10  }
  0x23   :  { %s819_s15 = smov [#allocation6]   ;;  %s787_s21 = scalar_lea.hbm %s956_s7, 1024 }
  0x24   :  { %s55_s16 = sshll.u32 %s819_s15, 4  ;;  %p788_p2 = scmp.ne.s32.totalorder %s956_s7, %s787_s21  ;;  %s56_s16 = int_to_ptr.vmem [resolvable:$true] %s55_s16 }
  0x25   :  { %p791_p3 = scmp.lt.u32.totalorder %s787_s21, %s956_s7 }
  0x27   :  { %p793_p4 = pnand %p791_p3, %p788_p2 }
  0x29   :  { %796 = shalt.err (!%p793_p4)
}
  0x2a   :  { %s797_s27 = scalar_lea.vmem %s56_s16, 1024  ;;  %p802_p6 = scmp.lt.s32.totalorder %s56_s16, %s56_s16 }
  0x2b   :  { %p798_p5 = scmp.ne.s32.totalorder %s56_s16, %s797_s27  ;;  %p803_p7 = scmp.lt.s32.totalorder %s797_s27, %s797_s27 }
  0x2d   :  { %p804_p8 = por %p803_p7, %p802_p6 }
  0x2f   :  { %p805_p9 = pnand %p804_p8, %p798_p5 }
  0x31   :  { %808 = shalt.err (!%p805_p9)
}
  0x32   :  { %61 = dma.hbm_to_vmem [thread:$0]  %s956_s7, 1024, %s56_s16, [#allocation5], %s814_s19, %s814_s19, %s815_s20  }
  0x33   :  { %809 = dma.done.wait [#allocation3], 2048  }
  0x34   :  { %810 = vsyncadd [#allocation3], 4294965248 }
  0x35   :  { %811 = dma.done.wait [#allocation5], 3072  }
  0x36   :  { %812 = vsyncadd [#allocation5], 4294964224  ;;  %v820_v0 = vmov 0.0   ;;  %vm821_vm0 = vmmov 0   ;;  %vm87_vm1 = vcmask 1043456   ;;  %vm83_vm2 = vcmask 64512  }
  0x37   :  { %659 = vmatprep.subr.bf16.mxu0 %v820_v0  ;;  %661 = vmatprep.mubr.msk.bf16.mxu0 %vm821_vm0, %v820_v0  ;;  %v75_v1 = vld [vmem:[%s950_s1] sm:$0xf]  ;;  %v695_v4 = vld [vmem:[#allocation2 + $0x4] ss:$8 sps:$4 sm:$0xff]   ;;  %v698_v6 = vld [vmem:[#allocation2 + $0x14] ss:$8 sps:$4 sm:$0xff]   ;;  %v151_v51 = vlaneseq }
  0x38   :  { %v74_v2 = vld [vmem:[%s949_s0] sm:$0xf]  ;;  %v89_v3 = vsel %vm87_vm1, %v75_v1, 0  ;;  %241 = vmatprep.subr.bf16.mxu1 %v695_v4  ;;  %v700_v7 = vld [vmem:[#allocation2 + $0x10] ss:$8 sps:$4 sm:$0xff]   ;;  %v822_v20 = vmov 0  }
  0x39   :  { %v697_v5 = vld [vmem:[#allocation2] ss:$8 sps:$4 sm:$0xff]   ;;  %660 = vmatpush3.bf16.msra.mxu0 %v89_v3  ;;  %v701_v8 = vld [vmem:[#allocation2 + $0x24] ss:$8 sps:$4 sm:$0xff]   ;;  %v704_v10 = vld [vmem:[#allocation2 + $0x34] ss:$8 sps:$4 sm:$0xff]   ;;  %273 = vmatprep.mubr.bf16.mxu1 %v822_v20 }
  0x3a   :  { %242 = vmatpush1.bf16.msra.mxu1 %v697_v5  ;;  %v703_v9 = vld [vmem:[#allocation2 + $0x20] ss:$8 sps:$4 sm:$0xff]   ;;  %v706_v11 = vld [vmem:[#allocation2 + $0x30] ss:$8 sps:$4 sm:$0xff]   ;;  %v707_v12 = vld [vmem:[#allocation2 + $0x44] ss:$8 sps:$4 sm:$0xff]  }
  0x3b   :  { %243 = vmatprep.subr.bf16.mxu1 %v698_v6  ;;  %v709_v13 = vld [vmem:[#allocation2 + $0x40] ss:$8 sps:$4 sm:$0xff]   ;;  %v710_v14 = vld [vmem:[#allocation2 + $0x54] ss:$8 sps:$4 sm:$0xff]   ;;  %v712_v15 = vld [vmem:[#allocation2 + $0x50] ss:$8 sps:$4 sm:$0xff]  }
  0x3c   :  { %662 = vmatmul.mubr.msk.bf16.vlgmr.msra.gmra.mrb[0].mxu0 %vm83_vm2, %v74_v2  ;;  %v713_v16 = vld [vmem:[#allocation2 + $0x64] ss:$8 sps:$4 sm:$0xff]   ;;  %v715_v17 = vld [vmem:[#allocation2 + $0x60] ss:$8 sps:$4 sm:$0xff]   ;;  %v716_v18 = vld [vmem:[#allocation2 + $0x74] ss:$8 sps:$4 sm:$0xff]  }
  0x3d   :  { %v718_v19 = vld [vmem:[#allocation2 + $0x70] ss:$8 sps:$4 sm:$0xff]   ;;  %v719_v21 = vld [vmem:[#allocation4 + $0x40] sm:$0xff]   ;;  %v721_v23 = vld [vmem:[#allocation4 + $0x48] sm:$0xff]   ;;  %v152_v52 = vshrl.u32 %v151_v51, 7 }
  0x3e   :  { %244 = vmatpush1.bf16.msra.mxu1 %v700_v7  ;;  %v720_v22 = vld [vmem:[#allocation4] sm:$0xff]   ;;  %628 = vmatprep.subr.bf16.mxu0 %v719_v21  ;;  %v722_v24 = vld [vmem:[#allocation4 + $0x8] sm:$0xff]   ;;  %v723_v25 = vld [vmem:[#allocation4 + $0x50] sm:$0xff]  }
  0x3f   :  { %245 = vmatprep.subr.bf16.mxu1 %v701_v8  ;;  %629 = vmatpush3.bf16.msra.mxu0 %v720_v22  ;;  %v724_v26 = vld [vmem:[#allocation4 + $0x10] sm:$0xff]   ;;  %v725_v27 = vld [vmem:[#allocation4 + $0x58] sm:$0xff]   ;;  %v727_v29 = vld [vmem:[#allocation4 + $0x60] sm:$0xff]   ;;  %v153_v53 = vsub.s32 0, %v152_v52  ;;  %v157_v55 = vsub.s32 1, %v152_v52 }
  0x40   :  { %630 = vmatprep.subr.bf16.mxu0 %v721_v23  ;;  %v726_v28 = vld [vmem:[#allocation4 + $0x18] sm:$0xff]   ;;  %v728_v30 = vld [vmem:[#allocation4 + $0x20] sm:$0xff]   ;;  %v729_v31 = vld [vmem:[#allocation4 + $0x68] sm:$0xff]  }
  0x41   :  { %v730_v32 = vld [vmem:[#allocation4 + $0x28] sm:$0xff]   ;;  %v731_v41 = vld [vmem:[#allocation4 + $0x70] sm:$0xff]   ;;  %v733_v43 = vld [vmem:[#allocation4 + $0x78] sm:$0xff]  }
  0x42   :  { %246 = vmatpush1.bf16.msra.mxu1 %v703_v9  ;;  %v582_v33 = vld [vmem:[%s951_s2] ss:$0 sm:$0xff]  ;;  %v732_v42 = vld [vmem:[#allocation4 + $0x30] sm:$0xff]   ;;  %v734_v44 = vld [vmem:[#allocation4 + $0x38] sm:$0xff]  }
  0x43   :  { %247 = vmatprep.subr.bf16.mxu1 %v704_v10  ;;  %631 = vmatpush3.bf16.msra.mxu0 %v722_v24  ;;  %v735_v45 = vld [vmem:[#allocation6] sm:$0xff]   ;;  %v736_v46 = vld [vmem:[#allocation6 + $0x8] sm:$0xff]   ;;  %v737_v47 = vld [vmem:[#allocation6 + $0x10] sm:$0xff]  }
  0x44   :  { %632 = vmatprep.subr.bf16.mxu0 %v723_v25  ;;  %v738_v48 = vld [vmem:[#allocation6 + $0x18] sm:$0xff]   ;;  %v739_v49 = vld [vmem:[#allocation6 + $0x20] sm:$0xff]   ;;  %v740_v50 = vld [vmem:[#allocation6 + $0x28] sm:$0xff]  }
  0x45   :  { %v149_v54 = vld [vmem:[%s953_s4] sm:$0x3]  ;;  %v741_v5 = vld [vmem:[#allocation6 + $0x30] sm:$0xff]   ;;  %v742_v6 = vld [vmem:[#allocation6 + $0x38] sm:$0xff]  }
  0x46   :  { %248 = vmatpush1.bf16.msra.mxu1 %v706_v11  ;;  %v154_v56 = vrot.slane %v149_v54, %v153_v53  ;;  %v158_v57 = vrot.slane %v149_v54, %v157_v55  ;;  %v600_v8 = vld [vmem:[%s955_s6] ss:$0 sm:$0xff] }
  0x47   :  { %249 = vmatprep.subr.bf16.mxu1 %v707_v12  ;;  %633 = vmatpush3.bf16.msra.mxu0 %v724_v26 }
  0x48   :  { %634 = vmatprep.subr.bf16.mxu0 %v725_v27 }
  0x4a   :  { %250 = vmatpush1.bf16.msra.mxu1 %v709_v13 }
  0x4b   :  { %251 = vmatprep.subr.bf16.mxu1 %v710_v14  ;;  %635 = vmatpush3.bf16.msra.mxu0 %v726_v28 }
  0x4c   :  { %636 = vmatprep.subr.bf16.mxu0 %v727_v29 }
  0x4e   :  { %252 = vmatpush1.bf16.msra.mxu1 %v712_v15 }
  0x4f   :  { %253 = vmatprep.subr.bf16.mxu1 %v713_v16  ;;  %637 = vmatpush3.bf16.msra.mxu0 %v728_v30  ;;  %v617_v16 = vld [vmem:[%s957_s8] ss:$0 sm:$0xff] }
  0x50   :  { %638 = vmatprep.subr.bf16.mxu0 %v729_v31 }
  0x52   :  { %254 = vmatpush1.bf16.msra.mxu1 %v715_v17 }
  0x53   :  { %255 = vmatprep.subr.bf16.mxu1 %v716_v18  ;;  %639 = vmatpush3.bf16.msra.mxu0 %v730_v32 }
  0x54   :  { %640 = vmatprep.subr.bf16.mxu0 %v731_v41 }
  0x56   :  { %256 = vmatpush1.bf16.msra.mxu1 %v718_v19 }
  0x57   :  { %665 = vmatprep.subr.bf16.mxu1 %v820_v0  ;;  %641 = vmatpush3.bf16.msra.mxu0 %v732_v42 }
  0x58   :  { %642 = vmatprep.subr.bf16.mxu0 %v733_v43 }
  0x5b   :  { %643 = vmatpush3.bf16.msra.mxu0 %v734_v44 }
 0x10f   :  { %v125_v34 = vpop.f32.mrb[0].mxu0 }
 0x110   :  { %v126_v35 = vadd.f32 %v582_v33, %v125_v34  ;;  %v663_v36 = vpop.f32.mrb[1].mxu0 }
 0x111   :  { %v128_v37 = vpop.f32.mrb[2].mxu0 }
 0x112   :  { %v131_v38 = vmax.f32 %v126_v35, 0.0  ;;  %v664_v39 = vpop.f32.mrb[3].mxu0 }
 0x114   :  { %v132_v40 = vpack.c.bf16 %v131_v38, %v131_v38 }
 0x116   :  { %274 = vmatmul.mubr.bf16.vlgmr.msra.gmra.mrb[0].mxu1 %v132_v40 }
 0x117   :  { %681 = vmatprep.mubr.msk.bf16.mxu1 %vm821_vm0, %v820_v0  ;;  %666 = vmatpush3.bf16.msra.mxu1 %v735_v45 }
 0x118   :  { %667 = vmatprep.subr.bf16.mxu1 %v820_v0 }
 0x11b   :  { %668 = vmatpush3.bf16.msra.mxu1 %v736_v46 }
 0x11c   :  { %669 = vmatprep.subr.bf16.mxu1 %v820_v0 }
 0x11f   :  { %670 = vmatpush3.bf16.msra.mxu1 %v737_v47 }
 0x120   :  { %671 = vmatprep.subr.bf16.mxu1 %v820_v0 }
 0x123   :  { %672 = vmatpush3.bf16.msra.mxu1 %v738_v48 }
 0x124   :  { %673 = vmatprep.subr.bf16.mxu1 %v820_v0 }
 0x127   :  { %674 = vmatpush3.bf16.msra.mxu1 %v739_v49 }
 0x128   :  { %675 = vmatprep.subr.bf16.mxu1 %v820_v0 }
 0x12b   :  { %676 = vmatpush3.bf16.msra.mxu1 %v740_v50 }
 0x12c   :  { %677 = vmatprep.subr.bf16.mxu1 %v820_v0 }
 0x12f   :  { %678 = vmatpush3.bf16.msra.mxu1 %v741_v5 }
 0x130   :  { %679 = vmatprep.subr.bf16.mxu1 %v820_v0 }
 0x133   :  { %680 = vmatpush3.bf16.msra.mxu1 %v742_v6 }
 0x1e9   :  { %v275_v58 = vpop.f32.mrb[0].mxu1 }
 0x1ea   :  { %v276_v59 = vadd.f32 %v275_v58, %v154_v56  ;;  %v277_v60 = vpop.f32.mrb[1].mxu1 }
 0x1eb   :  { %v278_v61 = vadd.f32 %v277_v60, %v158_v57  ;;  %v279_v62 = vpop.f32.mrb[2].mxu1 }
 0x1ec   :  { %v282_v63 = vmax.f32 %v276_v59, 0.0  ;;  %v280_v1 = vpop.f32.mrb[3].mxu1 }
 0x1ed   :  { %v283_v2 = vmax.f32 %v278_v61, 0.0 }
 0x1ee   :  { %v284_v4 = vpack.c.bf16 %v282_v63, %v282_v63 }
 0x1ef   :  { %v285_v3 = vpack.c.bf16 %v283_v2, %v283_v2 }
 0x1f1   :  { %453 = vmatprep.mubr.bf16.mxu0 %v285_v3 }
 0x1f2   :  { %454 = vmatmul.mubr.bf16.vlgmr.msra.gmra.mrb[4].mxu0 %v284_v4 }
 0x2c5   :  { %v644_v7 = vpop.f32.mrb[4].mxu0 }
 0x2c6   :  { %v645_v9 = vpop.f32.mrb[5].mxu0 }
 0x2c7   :  { %v646_v10 = vadd.f32 %v645_v9, %v644_v7  ;;  %v647_v11 = vpop.f32.mrb[6].mxu0 }
 0x2c8   :  { %v648_v12 = vpop.f32.mrb[7].mxu0 }
 0x2c9   :  { %v456_v13 = vadd.f32 %v646_v10, %v600_v8 }
 0x2cb   :  { %v461_v14 = vmax.f32 %v456_v13, 0.0 }
 0x2cd   :  { %v462_v15 = vpack.c.bf16 %v461_v14, %v461_v14 }
 0x2cf   :  { %682 = vmatmul.mubr.bf16.vlgmr.msra.gmra.mrb[4].mxu1 %v462_v15 }
 0x3a2   :  { %v568_v0 = vpop.f32.mrb[4].mxu1 }
 0x3a3   :  { %v569_v17 = vadd.f32 %v617_v16, %v568_v0  ;;  %v683_v18 = vpop.f32.mrb[5].mxu1 }
 0x3a4   :  { %v571_v19 = vpop.f32.mrb[6].mxu1 }
 0x3a5   :  { %v574_v20 = vpack.c.bf16 %v569_v17, %v569_v17  ;;  %v684_v21 = vpop.f32.mrb[7].mxu1 }
 0x3a7   :  { %575 = vst [vmem:[%s958_s9] sm:$0xf] %v574_v20 }
 0x3a8   :  { %580 = vsyncpa [#allocation3], 1 }
 0x3a9   :  { %581 = vsyncpa [#allocation5], 1 }

</bundles_post_ra>
